<compile_context>
chip_gen: v5e
topology: v5e:2x2
jax: 0.10.0
libtpu: 0.0.40
codegen_flags: <defaults>
</compile_context>

<pallas_src>
import math

import jax
import jax.numpy as jnp
from jax import lax
from jax.experimental import pallas as pl
from jax.experimental.pallas import tpu as pltpu

LN_EPS = 1e-12
_VMEM_LIMIT = 48 * 1024 * 1024   # above v5e(16MiB)/v6e,v7x(32MiB) scoped defaults, < v7x physical


def _layernorm(h, gamma, beta):
    mu = jnp.mean(h, axis=-1, keepdims=True)
    var = jnp.mean(jnp.square(h - mu), axis=-1, keepdims=True)
    return (h - mu) * lax.rsqrt(var + LN_EPS) * gamma + beta


def _round_up(x, m):
    return (x + m - 1) // m * m


# -----------------------------------------------------------------------------
# Kernel 1: fused BertAttention.
# grid = (B, num_heads); head axis is an accumulator ("arbitrary"), batch is "parallel".
# Per step: packed per-head QKV matmul -> softmax -> ctx -> accumulate out-projection.
# Last head step: + bias + residual -> LayerNorm -> store.
# -----------------------------------------------------------------------------
def attention_kernel(x_ref, mask_ref, wqkv_ref, bqkv_ref, wo_ref,
                     bo_ref, g_ref, beta_ref, out_ref, acc_ref):
    h = pl.program_id(1)
    dh = wo_ref.shape[0]
    scale = 1.0 / math.sqrt(dh)

    @pl.when(h == 0)
    def _init():
        acc_ref[...] = jnp.zeros_like(acc_ref)

    x = x_ref[...]                                         # [S, H] f32 (kept for residual)
    xb = x.astype(jnp.bfloat16)

    # One packed QKV matmul per head: [S,H] @ [H,3*dh] (bf16 operands, f32 accumulate).
    qkv = (jnp.dot(xb, wqkv_ref[...], preferred_element_type=jnp.float32)
           + bqkv_ref[...])                                # [S, 3*dh] f32
    q = qkv[:, 0:dh]
    k = qkv[:, dh:2 * dh]
    v = qkv[:, 2 * dh:3 * dh]

    # Q @ K^T without explicit transpose: contract last axes of both.
    sc = lax.dot_general(q.astype(jnp.bfloat16), k.astype(jnp.bfloat16),
                         (((1,), (1,)), ((), ())),
                         preferred_element_type=jnp.float32)
    sc = sc * scale + mask_ref[...]                        # [S,S] + [1,S] additive mask
    sc = sc - jnp.max(sc, axis=-1, keepdims=True)
    e = jnp.exp(sc)
    inv = pl.reciprocal(jnp.sum(e, axis=-1, keepdims=True), approx=True)  # EUP slot
    p = e * inv

    ctx = jnp.dot(p.astype(jnp.bfloat16), v.astype(jnp.bfloat16),
                  preferred_element_type=jnp.float32)      # [S, dh]
    # Accumulate this head's slice of the output projection (rows h*dh:(h+1)*dh of Wo).
    acc_ref[...] += jnp.dot(ctx.astype(jnp.bfloat16), wo_ref[...],
                            preferred_element_type=jnp.float32)   # [S, H]

    @pl.when(h == pl.num_programs(1) - 1)
    def _finish():
        y = acc_ref[...] + bo_ref[...] + x
        out_ref[...] = _layernorm(y, g_ref[...], beta_ref[...]).astype(out_ref.dtype)


def bert_attention(x, add_mask, p):
    """x: [B,S,H] f32; add_mask: [B,1,S] additive (0 / -10000)."""
    B, S, H = x.shape
    nh = p["num_heads"]
    assert H % nh == 0
    dh = H // nh

    # Pack per-head weights in the wrapper (plain JAX, one cheap relayout outside Pallas).
    def split_w(w):   # [H,H] (out dim head-major) -> [nh, H, dh]
        return jnp.transpose(w.reshape(H, nh, dh), (1, 0, 2))

    def split_b(b):   # [1,H] -> [nh, 1, dh]
        return jnp.transpose(b.reshape(1, nh, dh), (1, 0, 2))

    wqkv = jnp.concatenate([split_w(p["wq"]), split_w(p["wk"]), split_w(p["wv"])],
                           axis=-1).astype(jnp.bfloat16)           # [nh, H, 3*dh]
    bqkv = jnp.concatenate([split_b(p["bq"]), split_b(p["bk"]), split_b(p["bv"])],
                           axis=-1).astype(jnp.float32)            # [nh, 1, 3*dh]
    wo = p["wo"].reshape(nh, dh, H).astype(jnp.bfloat16)           # [nh, dh, H] (row split)

    per_batch = lambda b, h: (b, 0, 0)
    per_head = lambda b, h: (h, 0, 0)
    const2d = lambda b, h: (0, 0)

    return pl.pallas_call(
        attention_kernel,
        out_shape=jax.ShapeDtypeStruct((B, S, H), jnp.float32),
        grid_spec=pltpu.PrefetchScalarGridSpec(
            num_scalar_prefetch=0,
            grid=(B, nh),
            in_specs=[
                pl.BlockSpec((pl.Squeezed(), S, H), per_batch),        # x[b] (const over h)
                pl.BlockSpec((pl.Squeezed(), 1, S), per_batch),        # additive mask[b]
                pl.BlockSpec((pl.Squeezed(), H, 3 * dh), per_head),    # packed QKV weights
                pl.BlockSpec((pl.Squeezed(), 1, 3 * dh), per_head),    # packed QKV biases
                pl.BlockSpec((pl.Squeezed(), dh, H), per_head),        # Wo row-slice
                pl.BlockSpec((1, H), const2d),                         # bo
                pl.BlockSpec((1, H), const2d),                         # LN gamma
                pl.BlockSpec((1, H), const2d),                         # LN beta
            ],
            out_specs=pl.BlockSpec((pl.Squeezed(), S, H), per_batch),
            scratch_shapes=[pltpu.VMEM((S, H), jnp.float32)],          # out-proj accumulator
        ),
        compiler_params=pltpu.CompilerParams(
            dimension_semantics=("parallel", "arbitrary"),
            vmem_limit_bytes=_VMEM_LIMIT),
    )(x, add_mask, wqkv, bqkv, wo, p["bo"], p["attn_ln_g"], p["attn_ln_b"])


# -----------------------------------------------------------------------------
# Kernel 2: fused knowledge FFN (entity masking + CokeBertIntermediate +
#           BertOutput_text + BertOutput_ent), row-tiled over B*S with tm~256.
# -----------------------------------------------------------------------------
def ffn_kernel(text_ref, ent_ref, ent_mask_ref,
               wi_ref, bi_ref, wie_ref,
               wot_ref, bot_ref, lnt_g_ref, lnt_b_ref,
               woe_ref, boe_ref, lne_g_ref, lne_b_ref,
               out_text_ref, out_ent_ref):
    att_text = text_ref[...]                                    # [TM, H] f32 (residual)
    att_ent = ent_ref[...] * ent_mask_ref[...]                  # [TM, He] f32 (residual)

    inter = (jnp.dot(att_text.astype(jnp.bfloat16), wi_ref[...],
                     preferred_element_type=jnp.float32)
             + jnp.dot(att_ent.astype(jnp.bfloat16), wie_ref[...],
                       preferred_element_type=jnp.float32)
             + bi_ref[...])
    inter = jax.nn.gelu(inter, approximate=False)               # [TM, I] f32
    inter_b = inter.astype(jnp.bfloat16)

    ot = jnp.dot(inter_b, wot_ref[...], preferred_element_type=jnp.float32) + bot_ref[...]
    out_text_ref[...] = _layernorm(ot + att_text, lnt_g_ref[...],
                                   lnt_b_ref[...]).astype(out_text_ref.dtype)

    oe = jnp.dot(inter_b, woe_ref[...], preferred_element_type=jnp.float32) + boe_ref[...]
    out_ent_ref[...] = _layernorm(oe + att_ent, lne_g_ref[...],
                                  lne_b_ref[...]).astype(out_ent_ref.dtype)


def knowledge_ffn(att_text, ent, ent_mask, p, *, tm=256):
    B, S, H = att_text.shape
    He = ent.shape[-1]
    I = p["wi"].shape[1]
    BS = B * S

    # Large, bf16-friendly row tile; pad B*S up to a multiple of tm (padded rows are
    # zeros -> LN outputs beta there, sliced away below).
    tm = min(tm, _round_up(BS, 16))
    BS_pad = _round_up(BS, tm)

    text2d = att_text.reshape(BS, H)
    ent2d = ent.reshape(BS, He)
    mask2d = ent_mask.reshape(BS, 1)
    if BS_pad != BS:
        pad = BS_pad - BS
        text2d = jnp.pad(text2d, ((0, pad), (0, 0)))
        ent2d = jnp.pad(ent2d, ((0, pad), (0, 0)))
        mask2d = jnp.pad(mask2d, ((0, pad), (0, 0)))

    # Resident weights in bf16 (halves VMEM footprint and weight DMA).
    wi = p["wi"].astype(jnp.bfloat16)
    wie = p["wie"].astype(jnp.bfloat16)
    wot = p["wot"].astype(jnp.bfloat16)
    woe = p["woe"].astype(jnp.bfloat16)

    full = lambda i: (0, 0)
    row = lambda i: (i, 0)
    out_text2d, out_ent2d = pl.pallas_call(
        ffn_kernel,
        out_shape=(jax.ShapeDtypeStruct((BS_pad, H), jnp.float32),
                   jax.ShapeDtypeStruct((BS_pad, He), jnp.float32)),
        grid_spec=pltpu.PrefetchScalarGridSpec(
            num_scalar_prefetch=0,
            grid=(BS_pad // tm,),
            in_specs=[
                pl.BlockSpec((tm, H), row),                 # attention_output_text rows
                pl.BlockSpec((tm, He), row),                # hidden_states_ent rows
                pl.BlockSpec((tm, 1), row),                 # ent_mask rows
                pl.BlockSpec((H, I), full), pl.BlockSpec((1, I), full),    # Wi, bi
                pl.BlockSpec((He, I), full),                               # Wie (no bias)
                pl.BlockSpec((I, H), full), pl.BlockSpec((1, H), full),    # Wot, bot
                pl.BlockSpec((1, H), full), pl.BlockSpec((1, H), full),    # LN_t gamma/beta
                pl.BlockSpec((I, He), full), pl.BlockSpec((1, He), full),  # Woe, boe
                pl.BlockSpec((1, He), full), pl.BlockSpec((1, He), full),  # LN_e gamma/beta
            ],
            out_specs=[pl.BlockSpec((tm, H), row),
                       pl.BlockSpec((tm, He), row)],
        ),
        compiler_params=pltpu.CompilerParams(
            dimension_semantics=("parallel",),
            vmem_limit_bytes=_VMEM_LIMIT),
    )(text2d, ent2d, mask2d,
      wi, p["bi"], wie,
      wot, p["bot"], p["out_ln_t_g"], p["out_ln_t_b"],
      woe, p["boe"], p["out_ln_e_g"], p["out_ln_e_b"])
    return out_text2d[:BS].reshape(B, S, H), out_ent2d[:BS].reshape(B, S, He)


# -----------------------------------------------------------------------------
# Full module forward (glue in plain JAX)
# -----------------------------------------------------------------------------
def knowledge_layer(text, add_mask_text, ent, ent_mask, p):
    att_text = bert_attention(text, add_mask_text, p)
    return knowledge_ffn(att_text, ent, ent_mask, p)


def dynamic_knowledge_context_encoder(layer_params, hidden_states_text,
                                      attention_mask_text, hidden_states_ent,
                                      attention_mask_ent, ent_mask):
    # attention_mask_ent is unused by the layer forward (matches the PyTorch module).
    del attention_mask_ent
    add_mask = (1.0 - attention_mask_text.astype(jnp.float32))[:, None, :] * -10000.0
    text, ent = hidden_states_text, hidden_states_ent
    for p in layer_params:
        text, ent = knowledge_layer(text, add_mask, ent, ent_mask, p)
    return text, ent


if __name__ == "__main__":
    # Small config consistent with the module.
    B, S, H = 2, 8, 32      # batch, seq, hidden_size
    He = 16                 # hidden_size_ent
    I = 128                 # intermediate_size (lane-dense)
    NH = 4                  # num_attention_heads
    NUM_LAYERS = 2          # number of 'knowledge_enc' layers

    key = jax.random.PRNGKey(0)
    keys = jax.random.split(key, NUM_LAYERS + 4)

    def make_layer_params(k):
        ks = jax.random.split(k, 8)
        w = lambda kk, shape: jax.random.normal(kk, shape, jnp.float32) * 0.02
        return {
            "num_heads": NH,
            "wq": w(ks[0], (H, H)), "bq": jnp.zeros((1, H), jnp.float32),
            "wk": w(ks[1], (H, H)), "bk": jnp.zeros((1, H), jnp.float32),
            "wv": w(ks[2], (H, H)), "bv": jnp.zeros((1, H), jnp.float32),
            "wo": w(ks[3], (H, H)), "bo": jnp.zeros((1, H), jnp.float32),
            "attn_ln_g": jnp.ones((1, H), jnp.float32),
            "attn_ln_b": jnp.zeros((1, H), jnp.float32),
            "wi": w(ks[4], (H, I)), "bi": jnp.zeros((1, I), jnp.float32),
            "wie": w(ks[5], (He, I)),
            "wot": w(ks[6], (I, H)), "bot": jnp.zeros((1, H), jnp.float32),
            "out_ln_t_g": jnp.ones((1, H), jnp.float32),
            "out_ln_t_b": jnp.zeros((1, H), jnp.float32),
            "woe": w(ks[7], (I, He)), "boe": jnp.zeros((1, He), jnp.float32),
            "out_ln_e_g": jnp.ones((1, He), jnp.float32),
            "out_ln_e_b": jnp.zeros((1, He), jnp.float32),
        }

    layer_params = [make_layer_params(keys[i]) for i in range(NUM_LAYERS)]

    text = jax.random.normal(keys[NUM_LAYERS], (B, S, H), jnp.float32)
    ent = jax.random.normal(keys[NUM_LAYERS + 1], (B, S, He), jnp.float32)
    attention_mask_text = jnp.ones((B, S), jnp.float32).at[:, S - 2:].set(0.0)
    attention_mask_ent = jnp.ones((B, S), jnp.float32)     # unused by the forward
    ent_mask = (jax.random.uniform(keys[NUM_LAYERS + 2], (B, S, 1)) > 0.5
                ).astype(jnp.float32)

    out_text, out_ent = dynamic_knowledge_context_encoder(
        layer_params, text, attention_mask_text, ent, attention_mask_ent, ent_mask)
    jax.block_until_ready((out_text, out_ent))

    assert out_text.shape == (B, S, H)
    assert out_ent.shape == (B, S, He)

    # Pure-JAX reference with the same bf16-operand / f32-accumulate matmul convention.
    def ref_forward(params_list, text, mask_text, ent, ent_mask):
        def ln(h, g, b):
            mu = h.mean(-1, keepdims=True)
            var = ((h - mu) ** 2).mean(-1, keepdims=True)
            return (h - mu) * lax.rsqrt(var + LN_EPS) * g + b

        def mm(a, b, eq):
            return jnp.einsum(eq, a.astype(jnp.bfloat16), b.astype(jnp.bfloat16),
                              preferred_element_type=jnp.float32)

        add_mask = (1.0 - mask_text)[:, None, None, :] * -10000.0   # [B,1,1,S]
        for p in params_list:
            nh = p["num_heads"]; dh = H // nh
            q = (mm(text, p["wq"], "bsh,hk->bsk") + p["bq"]).reshape(B, S, nh, dh)
            k = (mm(text, p["wk"], "bsh,hk->bsk") + p["bk"]).reshape(B, S, nh, dh)
            v = (mm(text, p["wv"], "bsh,hk->bsk") + p["bv"]).reshape(B, S, nh, dh)
            sc = mm(q, k, "bsnd,btnd->bnst") / math.sqrt(dh) + add_mask
            pr = jax.nn.softmax(sc, axis=-1)
            ctx = mm(pr, v, "bnst,btnd->bsnd").reshape(B, S, H)
            att_text = ln(mm(ctx, p["wo"], "bsh,hk->bsk") + p["bo"] + text,
                          p["attn_ln_g"], p["attn_ln_b"])
            att_ent = ent * ent_mask
            inter = jax.nn.gelu(mm(att_text, p["wi"], "bsh,hi->bsi") + p["bi"]
                                + mm(att_ent, p["wie"], "bse,ei->bsi"),
                                approximate=False)
            text = ln(mm(inter, p["wot"], "bsi,ih->bsh") + p["bot"] + att_text,
                      p["out_ln_t_g"], p["out_ln_t_b"])
            ent = ln(mm(inter, p["woe"], "bsi,ie->bse") + p["boe"] + att_ent,
                     p["out_ln_e_g"], p["out_ln_e_b"])
        return text, ent

    ref_text, ref_ent = ref_forward(layer_params, text, attention_mask_text,
                                    ent, ent_mask)
    # bf16 matmul operands + approx reciprocal in the kernel => looser tolerance than f32.
    assert jnp.allclose(out_text, ref_text, atol=2e-2, rtol=2e-2), \
        float(jnp.max(jnp.abs(out_text - ref_text)))
    assert jnp.allclose(out_ent, ref_ent, atol=2e-2, rtol=2e-2), \
        float(jnp.max(jnp.abs(out_ent - ref_ent)))

    print("KERNEL_OK")
</pallas_src>

<mosaic_0001>
module attributes {stable_mosaic.version = 11 : i64} {
  func.func @attention_kernel(%arg0: i32, %arg1: i32, %arg2: memref<1x8x32xf32, #tpu.memory_space<vmem>>, %arg3: memref<1x1x8xf32, #tpu.memory_space<vmem>>, %arg4: memref<1x32x24xbf16, #tpu.memory_space<vmem>>, %arg5: memref<1x1x24xf32, #tpu.memory_space<vmem>>, %arg6: memref<1x8x32xbf16, #tpu.memory_space<vmem>>, %arg7: memref<1x32xf32, #tpu.memory_space<vmem>>, %arg8: memref<1x32xf32, #tpu.memory_space<vmem>>, %arg9: memref<1x32xf32, #tpu.memory_space<vmem>>, %arg10: memref<1x8x32xf32, #tpu.memory_space<vmem>>, %arg11: memref<8x32xf32, #tpu.memory_space<vmem>>) attributes {dimension_semantics = [#tpu.dimension_semantics<parallel>, #tpu.dimension_semantics<arbitrary>], iteration_bounds = array<i64: 2, 4>, scalar_prefetch = 0 : i64, scratch_operands = 1 : i64, tpu.core_type = #tpu.core_type<tc>, window_params = [{transform_indices = @transform_0, window_bounds = array<i64: 1, 8, 32>}, {transform_indices = @transform_1, window_bounds = array<i64: 1, 1, 8>}, {transform_indices = @transform_2, window_bounds = array<i64: 1, 32, 24>}, {transform_indices = @transform_3, window_bounds = array<i64: 1, 1, 24>}, {transform_indices = @transform_4, window_bounds = array<i64: 1, 8, 32>}, {pipeline_mode = #tpu.pipeline_mode<synchronous>, transform_indices = @transform_5, window_bounds = array<i64: 1, 32>}, {pipeline_mode = #tpu.pipeline_mode<synchronous>, transform_indices = @transform_6, window_bounds = array<i64: 1, 32>}, {pipeline_mode = #tpu.pipeline_mode<synchronous>, transform_indices = @transform_7, window_bounds = array<i64: 1, 32>}, {transform_indices = @transform_8, window_bounds = array<i64: 1, 8, 32>}]} {
    %c0_i32 = arith.constant 0 : i32
    %0 = arith.cmpi eq, %arg1, %c0_i32 : i32
    %1 = arith.extui %0 : i1 to i32
    %c0_i32_0 = arith.constant 0 : i32
    %2 = arith.cmpi ne, %1, %c0_i32_0 : i32
    scf.if %2 {
      %cst_26 = arith.constant 0.000000e+00 : f32
      %48 = vector.broadcast %cst_26 : f32 to vector<8x32xf32>
      %c0_27 = arith.constant 0 : index
      %c0_28 = arith.constant 0 : index
      %49 = vector.load %arg11[%c0_27, %c0_28] : memref<8x32xf32, #tpu.memory_space<vmem>>, vector<8x32xf32>
      tpu.vector_store %arg11[%c0_27, %c0_28], %48 {strides = array<i32>} : memref<8x32xf32, #tpu.memory_space<vmem>>, vector<8x32xf32>,
    } else {
    }
    %c0 = arith.constant 0 : index
    %c0_1 = arith.constant 0 : index
    %c0_2 = arith.constant 0 : index
    %3 = vector.load %arg2[%c0, %c0_1, %c0_2] : memref<1x8x32xf32, #tpu.memory_space<vmem>>, vector<1x8x32xf32>
    %4 = vector.shape_cast %3 : vector<1x8x32xf32> to vector<8x32xf32>
    %5 = arith.truncf %4 : vector<8x32xf32> to vector<8x32xbf16>
    %c0_3 = arith.constant 0 : index
    %c0_4 = arith.constant 0 : index
    %c0_5 = arith.constant 0 : index
    %6 = vector.load %arg4[%c0_3, %c0_4, %c0_5] : memref<1x32x24xbf16, #tpu.memory_space<vmem>>, vector<1x32x24xbf16>
    %7 = vector.shape_cast %6 : vector<1x32x24xbf16> to vector<32x24xbf16>
    %cst = arith.constant dense<0.000000e+00> : vector<8x24xf32>
    %8 = tpu.matmul %5, %7, %cst {dimension_numbers = #tpu.dot_dimension_numbers<[1], [0], [0], [1], [0, 0, 1, 1], [], []>} : vector<8x32xbf16>, vector<32x24xbf16>, vector<8x24xf32> -> vector<8x24xf32>
    %c0_6 = arith.constant 0 : index
    %c0_7 = arith.constant 0 : index
    %c0_8 = arith.constant 0 : index
    %9 = vector.load %arg5[%c0_6, %c0_7, %c0_8] : memref<1x1x24xf32, #tpu.memory_space<vmem>>, vector<1x1x24xf32>
    %10 = vector.shape_cast %9 : vector<1x1x24xf32> to vector<1x24xf32>
    %11 = vector.broadcast %10 : vector<1x24xf32> to vector<8x24xf32>
    %12 = arith.addf %8, %11 : vector<8x24xf32>
    %13 = vector.extract_strided_slice %12 {offsets = [0, 0], sizes = [8, 8], strides = [1, 1]} : vector<8x24xf32> to vector<8x8xf32>
    %14 = vector.extract_strided_slice %12 {offsets = [0, 8], sizes = [8, 8], strides = [1, 1]} : vector<8x24xf32> to vector<8x8xf32>
    %15 = vector.extract_strided_slice %12 {offsets = [0, 16], sizes = [8, 8], strides = [1, 1]} : vector<8x24xf32> to vector<8x8xf32>
    %16 = arith.truncf %13 : vector<8x8xf32> to vector<8x8xbf16>
    %17 = arith.truncf %14 : vector<8x8xf32> to vector<8x8xbf16>
    %cst_9 = arith.constant dense<0.000000e+00> : vector<8x8xf32>
    %18 = tpu.matmul %16, %17, %cst_9 {dimension_numbers = #tpu.dot_dimension_numbers<[1], [1], [0], [0], [0, 0, 1, 0], [], []>} : vector<8x8xbf16>, vector<8x8xbf16>, vector<8x8xf32> -> vector<8x8xf32>
    %cst_10 = arith.constant 0.353553385 : f32
    %19 = vector.broadcast %cst_10 : f32 to vector<8x8xf32>
    %20 = arith.mulf %18, %19 : vector<8x8xf32>
    %c0_11 = arith.constant 0 : index
    %c0_12 = arith.constant 0 : index
    %c0_13 = arith.constant 0 : index
    %21 = vector.load %arg3[%c0_11, %c0_12, %c0_13] : memref<1x1x8xf32, #tpu.memory_space<vmem>>, vector<1x1x8xf32>
    %22 = vector.shape_cast %21 : vector<1x1x8xf32> to vector<1x8xf32>
    %23 = vector.broadcast %22 : vector<1x8xf32> to vector<8x8xf32>
    %24 = arith.addf %20, %23 : vector<8x8xf32>
    %cst_14 = arith.constant dense<0xFF800000> : vector<8xf32>
    %25 = vector.multi_reduction <maximumf>, %24, %cst_14 [1] : vector<8x8xf32> to vector<8xf32>
    %26 = vector.shape_cast %25 : vector<8xf32> to vector<8x1xf32>
    %27 = vector.broadcast %26 : vector<8x1xf32> to vector<8x8xf32>
    %28 = arith.subf %24, %27 : vector<8x8xf32>
    %29 = math.exp %28 : vector<8x8xf32>
    %cst_15 = arith.constant dense<0.000000e+00> : vector<8xf32>
    %30 = vector.multi_reduction <add>, %29, %cst_15 [1] : vector<8x8xf32> to vector<8xf32>
    %31 = vector.shape_cast %30 : vector<8xf32> to vector<8x1xf32>
    %32 = tpu.reciprocal %31 {approx = true} : vector<8x1xf32> -> vector<8x1xf32>
    %33 = vector.broadcast %32 : vector<8x1xf32> to vector<8x8xf32>
    %34 = arith.mulf %29, %33 : vector<8x8xf32>
    %35 = arith.truncf %34 : vector<8x8xf32> to vector<8x8xbf16>
    %36 = arith.truncf %15 : vector<8x8xf32> to vector<8x8xbf16>
    %cst_16 = arith.constant dense<0.000000e+00> : vector<8x8xf32>
    %37 = tpu.matmul %35, %36, %cst_16 {dimension_numbers = #tpu.dot_dimension_numbers<[1], [0], [0], [1], [0, 0, 1, 1], [], []>} : vector<8x8xbf16>, vector<8x8xbf16>, vector<8x8xf32> -> vector<8x8xf32>
    %c0_17 = arith.constant 0 : index
    %c0_18 = arith.constant 0 : index
    %38 = vector.load %arg11[%c0_17, %c0_18] : memref<8x32xf32, #tpu.memory_space<vmem>>, vector<8x32xf32>
    %39 = arith.truncf %37 : vector<8x8xf32> to vector<8x8xbf16>
    %c0_19 = arith.constant 0 : index
    %c0_20 = arith.constant 0 : index
    %c0_21 = arith.constant 0 : index
    %40 = vector.load %arg6[%c0_19, %c0_20, %c0_21] : memref<1x8x32xbf16, #tpu.memory_space<vmem>>, vector<1x8x32xbf16>
    %41 = vector.shape_cast %40 : vector<1x8x32xbf16> to vector<8x32xbf16>
    %cst_22 = arith.constant dense<0.000000e+00> : vector<8x32xf32>
    %42 = tpu.matmul %39, %41, %cst_22 {dimension_numbers = #tpu.dot_dimension_numbers<[1], [0], [0], [1], [0, 0, 1, 1], [], []>} : vector<8x8xbf16>, vector<8x32xbf16>, vector<8x32xf32> -> vector<8x32xf32>
    %43 = arith.addf %38, %42 : vector<8x32xf32>
    %c0_23 = arith.constant 0 : index
    %c0_24 = arith.constant 0 : index
    %44 = vector.load %arg11[%c0_23, %c0_24] : memref<8x32xf32, #tpu.memory_space<vmem>>, vector<8x32xf32>
    tpu.vector_store %arg11[%c0_23, %c0_24], %43 {strides = array<i32>} : memref<8x32xf32, #tpu.memory_space<vmem>>, vector<8x32xf32>,
    %c3_i32 = arith.constant 3 : i32
    %45 = arith.cmpi eq, %arg1, %c3_i32 : i32
    %46 = arith.extui %45 : i1 to i32
    %c0_i32_25 = arith.constant 0 : i32
    %47 = arith.cmpi ne, %46, %c0_i32_25 : i32
    scf.if %47 {
      %c0_26 = arith.constant 0 : index
      %c0_27 = arith.constant 0 : index
      %48 = vector.load %arg11[%c0_26, %c0_27] : memref<8x32xf32, #tpu.memory_space<vmem>>, vector<8x32xf32>
      %c0_28 = arith.constant 0 : index
      %c0_29 = arith.constant 0 : index
      %49 = vector.load %arg7[%c0_28, %c0_29] : memref<1x32xf32, #tpu.memory_space<vmem>>, vector<1x32xf32>
      %50 = vector.broadcast %49 : vector<1x32xf32> to vector<8x32xf32>
      %51 = arith.addf %48, %50 : vector<8x32xf32>
      %52 = arith.addf %51, %4 : vector<8x32xf32>
      %c0_30 = arith.constant 0 : index
      %c0_31 = arith.constant 0 : index
      %53 = vector.load %arg8[%c0_30, %c0_31] : memref<1x32xf32, #tpu.memory_space<vmem>>, vector<1x32xf32>
      %c0_32 = arith.constant 0 : index
      %c0_33 = arith.constant 0 : index
      %54 = vector.load %arg9[%c0_32, %c0_33] : memref<1x32xf32, #tpu.memory_space<vmem>>, vector<1x32xf32>
      %cst_34 = arith.constant dense<0.000000e+00> : vector<8xf32>
      %55 = vector.multi_reduction <add>, %52, %cst_34 [1] : vector<8x32xf32> to vector<8xf32>
      %56 = vector.shape_cast %55 : vector<8xf32> to vector<8x1xf32>
      %cst_35 = arith.constant 3.200000e+01 : f32
      %57 = vector.broadcast %cst_35 : f32 to vector<8x1xf32>
      %58 = arith.divf %56, %57 : vector<8x1xf32>
      %59 = vector.broadcast %58 : vector<8x1xf32> to vector<8x32xf32>
      %60 = arith.subf %52, %59 : vector<8x32xf32>
      %61 = arith.mulf %60, %60 : vector<8x32xf32>
      %cst_36 = arith.constant dense<0.000000e+00> : vector<8xf32>
      %62 = vector.multi_reduction <add>, %61, %cst_36 [1] : vector<8x32xf32> to vector<8xf32>
      %63 = vector.shape_cast %62 : vector<8xf32> to vector<8x1xf32>
      %cst_37 = arith.constant 3.200000e+01 : f32
      %64 = vector.broadcast %cst_37 : f32 to vector<8x1xf32>
      %65 = arith.divf %63, %64 : vector<8x1xf32>
      %66 = vector.broadcast %58 : vector<8x1xf32> to vector<8x32xf32>
      %67 = arith.subf %52, %66 : vector<8x32xf32>
      %cst_38 = arith.constant 9.99999996E-13 : f32
      %68 = vector.broadcast %cst_38 : f32 to vector<8x1xf32>
      %69 = arith.addf %65, %68 : vector<8x1xf32>
      %70 = math.rsqrt %69 : vector<8x1xf32>
      %71 = vector.broadcast %70 : vector<8x1xf32> to vector<8x32xf32>
      %72 = arith.mulf %67, %71 : vector<8x32xf32>
      %73 = vector.broadcast %53 : vector<1x32xf32> to vector<8x32xf32>
      %74 = arith.mulf %72, %73 : vector<8x32xf32>
      %75 = vector.broadcast %54 : vector<1x32xf32> to vector<8x32xf32>
      %76 = arith.addf %74, %75 : vector<8x32xf32>
      %c0_39 = arith.constant 0 : index
      %c0_40 = arith.constant 0 : index
      %c0_41 = arith.constant 0 : index
      %77 = vector.load %arg10[%c0_39, %c0_40, %c0_41] : memref<1x8x32xf32, #tpu.memory_space<vmem>>, vector<1x8x32xf32>
      %78 = vector.shape_cast %77 : vector<1x8x32xf32> to vector<8x32xf32>
      %79 = vector.shape_cast %76 : vector<8x32xf32> to vector<1x8x32xf32>
      tpu.vector_store %arg10[%c0_39, %c0_40, %c0_41], %79 {strides = array<i32>} : memref<1x8x32xf32, #tpu.memory_space<vmem>>, vector<1x8x32xf32>,
    } else {
    }
    return
  }
  func.func @transform_0(%arg0: i32, %arg1: i32) -> (i32, i32, i32) {
    %c0_i32 = arith.constant 0 : i32
    %c0_i32_0 = arith.constant 0 : i32
    %c0_i32_1 = arith.constant 0 : i32
    return %arg0, %c0_i32, %c0_i32_0 : i32, i32, i32
  }
  func.func @transform_1(%arg0: i32, %arg1: i32) -> (i32, i32, i32) {
    %c0_i32 = arith.constant 0 : i32
    %c0_i32_0 = arith.constant 0 : i32
    %c0_i32_1 = arith.constant 0 : i32
    return %arg0, %c0_i32, %c0_i32_0 : i32, i32, i32
  }
  func.func @transform_2(%arg0: i32, %arg1: i32) -> (i32, i32, i32) {
    %c0_i32 = arith.constant 0 : i32
    %c0_i32_0 = arith.constant 0 : i32
    %c0_i32_1 = arith.constant 0 : i32
    return %arg1, %c0_i32, %c0_i32_0 : i32, i32, i32
  }
  func.func @transform_3(%arg0: i32, %arg1: i32) -> (i32, i32, i32) {
    %c0_i32 = arith.constant 0 : i32
    %c0_i32_0 = arith.constant 0 : i32
    %c0_i32_1 = arith.constant 0 : i32
    return %arg1, %c0_i32, %c0_i32_0 : i32, i32, i32
  }
  func.func @transform_4(%arg0: i32, %arg1: i32) -> (i32, i32, i32) {
    %c0_i32 = arith.constant 0 : i32
    %c0_i32_0 = arith.constant 0 : i32
    %c0_i32_1 = arith.constant 0 : i32
    return %arg1, %c0_i32, %c0_i32_0 : i32, i32, i32
  }
  func.func @transform_5(%arg0: i32, %arg1: i32) -> (i32, i32) {
    %c0_i32 = arith.constant 0 : i32
    %c0_i32_0 = arith.constant 0 : i32
    %c0_i32_1 = arith.constant 0 : i32
    return %c0_i32, %c0_i32_0 : i32, i32
  }
  func.func @transform_6(%arg0: i32, %arg1: i32) -> (i32, i32) {
    %c0_i32 = arith.constant 0 : i32
    %c0_i32_0 = arith.constant 0 : i32
    %c0_i32_1 = arith.constant 0 : i32
    return %c0_i32, %c0_i32_0 : i32, i32
  }
  func.func @transform_7(%arg0: i32, %arg1: i32) -> (i32, i32) {
    %c0_i32 = arith.constant 0 : i32
    %c0_i32_0 = arith.constant 0 : i32
    %c0_i32_1 = arith.constant 0 : i32
    return %c0_i32, %c0_i32_0 : i32, i32
  }
  func.func @transform_8(%arg0: i32, %arg1: i32) -> (i32, i32, i32) {
    %c0_i32 = arith.constant 0 : i32
    %c0_i32_0 = arith.constant 0 : i32
    %c0_i32_1 = arith.constant 0 : i32
    return %arg0, %c0_i32, %c0_i32_0 : i32, i32, i32
  }
}

</mosaic_0001>

<bundles_post_ra>
// kernel: tpu_custom_call.1
= control target key start
LH: loop header
LB: loop body
LE: loop exit
PB: predicated region body
PF: predicated region fallthrough
CT: control target
= control target key end

     0   :  { %s1131_s0 = inlined_call_operand.vmem [shape: f32[2,8,32], index: 0, kind: input, shape index: {}]   ;;  %s1132_s1 = inlined_call_operand.vmem [shape: f32[2,1,8], index: 1, kind: input, shape index: {}]   ;;  %s1133_s2 = inlined_call_operand.vmem [shape: bf16[4,32,24], index: 2, kind: input, shape index: {}]   ;;  %s1134_s3 = inlined_call_operand.vmem [shape: f32[4,1,24], index: 3, kind: input, shape index: {}]   ;;  %s1135_s4 = inlined_call_operand.vmem [shape: bf16[4,8,32], index: 4, kind: input, shape index: {}]   ;;  %s1136_s5 = inlined_call_operand.vmem [shape: f32[1,32], index: 5, kind: input, shape index: {}]   ;;  %s1137_s6 = inlined_call_operand.vmem [shape: f32[1,32], index: 6, kind: input, shape index: {}]   ;;  %s1138_s7 = inlined_call_operand.vmem [shape: f32[1,32], index: 7, kind: input, shape index: {}]   ;;  %s1139_s8 = inlined_call_operand.hbm [shape: f32[2,8,32], index: 8, kind: output, shape index: {}]  }
   0x1   :  { %1153 = sst [smem:[#allocation17_spill]] %s1139_s8 }
   0x2   :  { %13 = vsyncpa [#allocation4], 0 }
   0x3   :  { %15 = vsyncpa [#allocation4 + $0x1], 0  ;;  %s955_s27 = smov 0   ;;  %s957_s28 = smov 0  }
   0x4   :  { %s959_s29 = smov 0   ;;  %s961_s30 = smov 0  }
   0x5   :  { %s963_s9 = smov 0   ;;  %s965_s10 = smov 0  }
   0x6   :  { %s967_s11 = smov 0   ;;  %s969_s12 = smov 0  }
   0x7 LB: > { %1154 = sst [smem:[#allocation6_spill]] %s876_s27  ;;  %s691_s13 = sadd.s32 4294967295, %s904_s12   ;;  %s904_s12 = sphi %s969_s12, %s21_s12   ;;  %s900_s11 = sphi %s967_s11, %s1180_s11   ;;  %s896_s10 = sphi %s965_s10, %s1179_s10   ;;  %s892_s9 = sphi %s963_s9, %s1178_s9   ;;  %s888_s30 = sphi %s961_s30, %s1177_s30   ;;  %s884_s29 = sphi %s959_s29, %s1176_s29   ;;  %s880_s28 = sphi %s957_s28, %s1175_s28   ;;  %s876_s27 = sphi %s955_s27, %s1174_s27  }
   0x8   : > { %1155 = sst [smem:[#allocation7_spill]] %s880_s28  ;;  %s692_s14 = sadd.s32 4294967294, %s904_s12  }
   0x9   : > { %1156 = sst [smem:[#allocation8_spill]] %s884_s29  ;;  %s30_s15 = sadd.s32 1, %s896_s10 }
   0xa   : > { %1157 = sst [smem:[#allocation9_spill]] %s896_s10  ;;  %p31_p0 = scmp.ge.s32.totalorder %s30_s15, 4 }
   0xb   : > { %1158 = sst [smem:[#allocation10_spill]] %s900_s11  ;;  %s33_s16 = sadd.s32 1, %s900_s11 }
   0xc   : > { %1159 = sst [smem:[#allocation11_spill]] %s904_s12  ;;  %p243_p1 = scmp.ne.s32.totalorder %s884_s29, %s880_s28 }
   0xd   : > { %p244_p2 = scmp.eq.s32.totalorder %s691_s13, 7  ;;  %s1182_s15 = smov (%p31_p0, %s30_s15), 0 }
   0xe   : > { %1160 = sst [smem:[#allocation12_spill]] %s1182_s15  ;;  %s1184_s16 = smov (!%p31_p0, %s33_s16), %s900_s11 }
   0xf   : > { %p1004_p3 = por %p244_p2, %p243_p1  ;;  %p249_p4 = scmp.ne.s32.totalorder %s880_s28, %s876_s27 }
  0x10   : > { %p35_p5 = scmp.ge.s32.totalorder %s1184_s16, 2  ;;  %p250_p6 = scmp.eq.s32.totalorder %s692_s14, 7 }
  0x11   : > { %s1161_s17 = scalar_select %p1004_p3, 1, 0 }
  0x12   : > { %p695_p7 = scmp.ge.s32.totalorder %s904_s12, 1  ;;  %p311_p8 = scmp.lt.s32.totalorder %s904_s12, 9 }
  0x13   : > { %1162 = sst [smem:[#allocation13_spill]] %s1161_s17  ;;  %s1186_s16 = smov (%p35_p5, %s1184_s16), 0 }
  0x14   : > { %1163 = sst [smem:[#allocation14_spill]] %s1186_s16  ;;  %p1014_p9 = por %p250_p6, %p249_p4 }
  0x15   : > { %p312_p10 = pnand %p695_p7, %p311_p8  ;;  %s230_s19 = ssub.s32 %s900_s11, %s1186_s16 }
  0x16   : > { %s1164_s18 = scalar_select %p1014_p9, 1, 0 }
  0x17   : > { %s233_s20 = sadd.s32 1, %s884_s29  ;;  %p231_p11 = scmp.eq.s32.totalorder %s230_s19, 0 }
  0x18   : > { %1165 = sst [smem:[#allocation15_spill]] %s1164_s18  ;;  %315 = sbr.rel (%p312_p10) target bundleno = 1277 (0x4fd), region = 52 }
  0x19   : > { %s1022_s21 = scalar_select %p231_p11, %s884_s29, %s233_s20  }
  0x1a   : > { %s1143_s22 = sand.u32 (!%p312_p10), 1, %s880_s28   ;;  %p359_p12 = scmp.lt.s32.totalorder (!%p312_p10), %s892_s9, 1 }
  0x1b   : > { %1166 = sst [smem:[#allocation16_spill]] %s1022_s21  ;;  %s1028_s23 = sshll.u32 (!%p312_p10), %s1143_s22, 3 }
  0x1c   : > { %p366_p13 = scmp.lt.s32.totalorder (!%p312_p10), %s888_s30, 3  ;;  %s358_s13 = scalar_lea.vmem (!%p312_p10), [#allocation3], %s1028_s23 }
  0x1d   : > { %s1032_s24 = scalar_select %p359_p12, %s892_s9, 1 }
  0x1e   : > { %s367_s25 = scalar_select %p366_p13, %s888_s30, 3 }
  0x1f   : > { %s697_s26 = sshll.u32 %s1032_s24, 3  ;;  %s365_s19 = scalar_lea.vmem %s1132_s1, %s1032_s24 }
  0x20   : > { %s362_s15 = scalar_lea.vmem %s1131_s0, %s697_s26  ;;  %s719_s11 = sshll.u32 %s367_s25, 4 }
  0x21   : > { %s370_s21 = scalar_lea.vmem %s1133_s2, %s719_s11  ;;  %s373_s27 = scalar_lea.vmem %s1134_s3, %s367_s25 }
  0x22   : > { %s700_s12 = sshll.u32 %s367_s25, 2  ;;  %p701_p0 = scmp.ne.s32.totalorder %s888_s30, 0 }
  0x23   : > { %s1052_s28 = scalar_lea.vmem %s1135_s4, %s700_s12 }
  0x24   : > { %382 = sbr.rel (%p701_p0) target bundleno = 43 (0x2b), region = 56 }
  0x29   : > { %vm383_vm0 = vcmask 261120   ;;  %v906_v0 = vmov 0.0  }
  0x2a   : > { %384 = vst.msk [vmem:[#allocation2] sm:$0xff] %vm383_vm0, %v906_v0 }
  0x2b PF: > { %v721_v1 = vld [vmem:[%s370_s21 + $0x8] sm:$0xff]  ;;  %v720_v2 = vld [vmem:[%s370_s21] sm:$0xff]  ;;  %vm407_vm1 = vcmask 261120   ;;  %s907_s8 = smov 120   ;;  %vm428_vm2 = vcmask 64512   ;;  %vm471_vm3 = vcmask 1043456  }
  0x2c   : > { %417 = vmatpush.bf16.msra.mxu0 %v721_v1  ;;  %v385_v3 = vld [vmem:[%s362_s15] sm:$0xff]  ;;  %p714_p1 = scmp.ne.s32.totalorder %s888_s30, 3 }
  0x2d   : > { %v386_v4 = vpack.c.bf16 %v385_v3, %v385_v3  ;;  %v797_v5 = vld [vmem:[%s373_s27] ss:$0 sm:$0xff]  ;;  %s908_s27 = smov 112  }
  0x2e   : > { %v798_v12 = vld [vmem:[%s365_s19] ss:$0 sm:$0xff] }
  0x2f   : > { %v490_v29 = vld [vmem:[%s1052_s28] sm:$0xf] }
  0x30   : > { %418 = vmatpush.bf16.msra.mxu0 %v720_v2  ;;  %v495_v30 = vsel %vm471_vm3, %v490_v29, 0 }
  0x31   : > { %504 = vmatpush.bf16.msra.mxu3 %v495_v30  ;;  %v488_v34 = vld [vmem:[#allocation2] sm:$0xff] }
  0x33   : > { %710 = vmatmul.msk.bf16.vlgmr.msra.gmra.mxu0 %vm407_vm1, %v386_v4 }
  0xb0   : > { %v420_v6 = vpop.f32.mrf.mxu0 }
  0xb1   : > { %v421_v7 = vadd.f32 %v797_v5, %v420_v6 }
  0xb3   : > { %v424_v8 = vpack.c.bf16 %v421_v7, %v421_v7 }
  0xb5   : > { %426 = vrot.lane.b32.xlu0 %v424_v8, %s907_s8 }
  0xb8   : > { %v422_v9 = vpop.f32.mrf.mxu0 }
 0x127   : > { %v427_v10 = vpop.permute.xlu0 %426 }
 0x128   : > { %v433_v11 = vsel %vm428_vm2, %v427_v10, 0 }
 0x129   : > { %442 = vmatpush.bf16.xpose.msra.mxu1 %v433_v11 }
 0x130   : > { %711 = vmatmul.msk.bf16.vlgmr.msra.gmra.mxu1 %vm428_vm2, %v424_v8 }
 0x1ad   : > { %v444_v13 = vpop.f32.mrf.mxu1 }
 0x1ae   : > { %v448_v14 = vmul.f32 0.35355338, %v444_v13 }
 0x1b0   : > { %v453_v15 = vadd.f32 %v798_v12, %v448_v14 }
 0x1b2   : > { %v454_v16 = vsel %vm428_vm2, %v453_v15, -inf }
 0x1b3   : > { %455 = vmax.xlane.f32.xlu0 %v454_v16 }
 0x1b5   : > { %v446_v17 = vpop.f32.mrf.mxu1 }
 0x226   : > { %v456_v18 = vpop.xlane.xlu0 %455 }
 0x227   : > { %v457_v19 = vsub.f32 %v453_v15, %v456_v18 }
 0x229   : > { %v458_v20 = vmul.f32 1.442695, %v457_v19 }
 0x22b   : > { %799 = vpow2.f32 %v458_v20 }
 0x231   : > { %v800_v21 = vpop.eup %799 }
 0x232   : > { %v460_v22 = vsel %vm428_vm2, %v800_v21, 0.0 }
 0x233   : > { %461 = vadd.xlane.f32.xlu1 %v460_v22 }
 0x24c   : > { %466 = vrot.lane.b32.xlu1 %v424_v8, %s908_s27 }
 0x2a6   : > { %v462_v23 = vpop.xlane.xlu1 %461 }
 0x2a7   : > { %801 = vrcp.f32 %v462_v23 }
 0x2ad   : > { %v802_v24 = vpop.eup %801 }
 0x2ae   : > { %v464_v25 = vmul.f32 %v802_v24, %v800_v21 }
 0x2b0   : > { %v465_v28 = vpack.c.bf16 %v464_v25, %v464_v25 }
 0x2be   : > { %v467_v26 = vpop.permute.xlu1 %466 }
 0x2bf   : > { %v473_v27 = vsel %vm471_vm3, %v467_v26, 0 }
 0x2c0   : > { %482 = vmatpush.bf16.msra.mxu2 %v473_v27 }
 0x2c3   : > { %712 = vmatmul.msk.bf16.vlgmr.msra.gmra.mxu2 %vm428_vm2, %v465_v28 }
 0x346   : > { %v484_v31 = vpop.f32.mrf.mxu2 }
 0x347   : > { %v489_v32 = vpack.c.bf16 %v484_v31, %v484_v31 }
 0x349   : > { %713 = vmatmul.msk.bf16.vlgmr.msra.gmra.mxu3 %vm428_vm2, %v489_v32 }
 0x34e   : > { %v486_v33 = vpop.f32.mrf.mxu2 }
 0x3cc   : > { %v506_v35 = vpop.f32.mrf.mxu3 }
 0x3cd   : > { %v510_v36 = vadd.f32 %v506_v35, %v488_v34 }
 0x3cf   : > { %511 = vst.msk [vmem:[#allocation2] sm:$0xff] %vm407_vm1, %v510_v36 }
 0x3d0   : > { %515 = sbr.rel (%p714_p1) target bundleno = 1256 (0x4e8), region = 60 }
 0x3d4   : > { %v508_v37 = vpop.f32.mrf.mxu3 }
 0x3d5   : > { %v803_v39 = vld [vmem:[%s1136_s5] ss:$0 sm:$0xff]  ;;  %v909_v43 = vmov 32.0  }
 0x3d6   : > { %v516_v38 = vld [vmem:[#allocation2] sm:$0xff]  ;;  %806 = vrcp.f32 %v909_v43 }
 0x3d7   : > { %v521_v40 = vadd.f32 %v803_v39, %v516_v38  ;;  %v804_v0 = vld [vmem:[%s1137_s6] ss:$0 sm:$0xff] }
 0x3d8   : > { %v805_v2 = vld [vmem:[%s1138_s7] ss:$0 sm:$0xff] }
 0x3d9   : > { %v522_v41 = vadd.f32 %v521_v40, %v385_v3 }
 0x3db   : > { %v525_v42 = vsel %vm407_vm1, %v522_v41, 0.0 }
 0x3dc   : > { %526 = vadd.xlane.f32.xlu0 %v525_v42  ;;  %v807_v44 = vpop.eup %806 }
 0x3dd   : > { %v529_v45 = vmul.f32 32.0, %v807_v44  ;;  %vm533_vm4 = vweird.f32 %v807_v44 }
 0x3df   : > { %v530_v46 = vsub.f32 1.0, %v529_v45 }
 0x3e1   : > { %v531_v47 = vmul.f32 %v807_v44, %v530_v46 }
 0x3e3   : > { %v532_v48 = vadd.f32 %v807_v44, %v531_v47 }
 0x3e5   : > { %v534_v49 = vsel %vm533_vm4, %v807_v44, %v532_v48 }
 0x44f   : > { %v527_v50 = vpop.xlane.xlu0 %526 }
 0x450   : > { %v535_v51 = vmul.f32 %v534_v49, %v527_v50 }
 0x452   : > { %v536_v52 = vsub.f32 %v522_v41, %v535_v51 }
 0x454   : > { %v537_v53 = vmul.f32 %v536_v52, %v536_v52 }
 0x456   : > { %v538_v54 = vsel %vm407_vm1, %v537_v53, 0.0 }
 0x457   : > { %539 = vadd.xlane.f32.xlu0 %v538_v54 }
 0x4ca   : > { %v540_v55 = vpop.xlane.xlu0 %539 }
 0x4cb   : > { %v541_v56 = vmul.f32 %v540_v55, %v534_v49 }
 0x4cd   : > { %v542_v57 = vadd.f32 1e-12, %v541_v56 }
 0x4cf   : > { %808 = vrsqrt.f32 %v542_v57  ;;  %vm549_vm6 = vweird.f32 %v542_v57 }
 0x4d5   : > { %v809_v58 = vpop.eup %808 }
 0x4d6   : > { %v544_v59 = vmul.f32 %v809_v58, %v542_v57  ;;  %vm550_vm5 = vweird.f32 %v809_v58 }
 0x4d7   : > { %vm551_vm7 = vmor %vm549_vm6, %vm550_vm5 }
 0x4d8   : > { %v545_v60 = vmul.f32 %v809_v58, %v544_v59 }
 0x4da   : > { %v546_v61 = vmul.f32 0.5, %v545_v60 }
 0x4dc   : > { %v547_v62 = vsub.f32 1.5, %v546_v61 }
 0x4de   : > { %v548_v63 = vmul.f32 %v809_v58, %v547_v62 }
 0x4e0   : > { %v552_v1 = vsel %vm551_vm7, %v809_v58, %v548_v63 }
 0x4e1   : > { %v553_v3 = vmul.f32 %v552_v1, %v536_v52 }
 0x4e3   : > { %v557_v4 = vmul.f32 %v804_v0, %v553_v3 }
 0x4e5   : > { %v561_v5 = vadd.f32 %v805_v2, %v557_v4 }
 0x4e7   : > { %562 = vst.msk [vmem:[%s358_s13] sm:$0xff] %vm407_vm1, %v561_v5 }
 0x4e8 PF: > { %s1167_s17 = sld [smem:[#allocation7_spill]]  ;;  %s716_s21 = sshll.u32 %s892_s9, 3 }
 0x4e9   : > { %s1169_s25 = sld [smem:[#allocation17_spill]]  ;;  %s576_s14 = sshll.u32 %s358_s13, 4  ;;  %s577_s14 = int_to_ptr.vmem [resolvable:$true] %s576_s14 }
 0x4ee   : > { %s1170_s20 = sand.u32 1, %s1167_s17  }
 0x4ef   : > { %s574_s26 = scalar_lea.hbm %s1169_s25, %s716_s21  ;;  %s564_s8 = scalar_lea.sflag [#allocation4], %s1170_s20 }
 0x4f0   : > { %s578_s19 = sshll.u32 %s574_s26, 4  ;;  %s830_s11 = scalar_lea.hbm %s1169_s25, 16  ;;  %s579_s19 = int_to_ptr.hbm [resolvable:$true] %s578_s19 }
 0x4f1   : > { %s824_s29 = sshra.s32 %s579_s19, 4  ;;  %s825_s29 = int_to_ptr.hbm [resolvable:$true] %s824_s29 }
 0x4f2   : > { %s826_s10 = scalar_lea.hbm %s825_s29, 8  ;;  %p831_p6 = scmp.lt.s32.totalorder %s825_s29, %s1169_s25 }
 0x4f3   : > { %p827_p2 = scmp.ne.s32.totalorder %s825_s29, %s826_s10  ;;  %p832_p7 = scmp.lt.s32.totalorder %s830_s11, %s826_s10 }
 0x4f5   : > { %p828_p4 = pnand %p827_p2, %p1004_p3  ;;  %p833_p8 = por %p832_p7, %p831_p6 }
 0x4f7   : > { %p829_p5 = pneg %p828_p4 }
 0x4f9   : > { %p834_p10 = pnand %p833_p8, %p829_p5 }
 0x4fb   : > { %837 = shalt.err (!%p834_p10)
}
 0x4fc   : > { %722 = dma.vmem_to_hbm [thread:$0]  (%p1004_p3), %s577_s14, 128, %s579_s19, %s564_s8  }
 0x4fd PF: > { %s1171_s23 = sld [smem:[#allocation11_spill]] }
 0x4fe   : > { %s1172_s13 = sld [smem:[#allocation6_spill]] }
 0x503   : > { %p728_p11 = scmp.ge.s32.totalorder %s1171_s23, 2 }
 0x504   : > { %s590_s15 = sand.u32 1, %s1172_s13  }
 0x505   : > { %p725_p12 = pnand %p728_p11, %p1014_p9  ;;  %s591_s16 = scalar_lea.sflag [#allocation4], %s590_s15 }
 0x507   : > { %p726_p13 = pneg %p725_p12 }
 0x509   : > { %871 = dma.done.wait (%p726_p13), %s591_s16, 128  }
 0x50a   : > { %873 = vsyncadd (%p726_p13), %s591_s16, 4294967168  ;;  %s21_s12 = sadd.s32 1, %s1171_s23   ;;  %s1174_s27 = sld [smem:[#allocation7_spill]] }
 0x50b   : > { %p18_p0 = scmp.ge.s32.totalorder %s21_s12, 10   ;;  %s1175_s28 = sld [smem:[#allocation8_spill]] }
 0x50c   : > { %s1176_s29 = sld [smem:[#allocation16_spill]] }
 0x50d   : > { %s1177_s30 = sld [smem:[#allocation9_spill]]  ;;  %20 = sbr.rel (!%p18_p0) target bundleno = 7 (0x7), region = 107 }
 0x50e   : > { %s1178_s9 = sld [smem:[#allocation10_spill]] }
 0x50f   : > { %s1179_s10 = sld [smem:[#allocation12_spill]] }
 0x510   : > { %s1180_s11 = sld [smem:[#allocation14_spill]] }
 0x512   :  { %597 = vsyncpa [#allocation4], 1 }
 0x513   :  { %599 = vsyncpa [#allocation4 + $0x1], 1 }

</bundles_post_ra>
